<compile_context>
chip_gen: v6e
topology: v6e:2x2x1
jax: 0.10.0
libtpu: 0.0.40
codegen_flags: <defaults>
</compile_context>

<pallas_src>
import jax
import jax.numpy as jnp
from jax.experimental import pallas as pl
from jax.experimental.pallas import tpu as pltpu


_BLOCK_B = 512  # batch-tile (lane) width used once B exceeds it


def toy_model_kernel(xT_ref, w1_ref, b1_ref, w2_ref, b2_ref, oT_ref):
    # xT: (10, TB)  w1: (10, 10)  b1: (10, 1)  w2: (5, 10)  b2: (5, 1)
    xT = xT_ref[...]
    h = jnp.dot(w1_ref[...], xT, preferred_element_type=jnp.float32)   # (10, TB)
    h = jnp.maximum(h + b1_ref[...], 0.0)                              # bias + ReLU (VPU)
    y = jnp.dot(w2_ref[...], h, preferred_element_type=jnp.float32)    # (5, TB)
    oT_ref[...] = (y + b2_ref[...]).astype(oT_ref.dtype)               # lane-dense store


def pack_params(w1, b1, w2, b2):
    """One-time packing: keep PyTorch [out, in] weights, make biases (out, 1)."""
    return (jnp.asarray(w1, jnp.float32),
            jnp.asarray(b1, jnp.float32).reshape(-1, 1),
            jnp.asarray(w2, jnp.float32),
            jnp.asarray(b2, jnp.float32).reshape(-1, 1))


@jax.jit
def toy_model_forward(x, w1, b1c, w2, b2c):
    """x: (B, 10) f32; w1: (10, 10); b1c: (10, 1); w2: (5, 10); b2c: (5, 1).
    Returns (B, 5)."""
    B, in_f = x.shape
    hid = w1.shape[0]
    out_f = w2.shape[0]

    # Batch-on-lanes layout: the kernel consumes x^T and produces y^T.
    xT = x.T                                      # (10, B) -- fused under jit
    tb = B if B <= _BLOCK_B else _BLOCK_B         # full-dim block when B is small
    grid = (pl.cdiv(B, tb),)

    cost = pl.CostEstimate(
        flops=2 * B * in_f * hid + 2 * B * hid * out_f,
        transcendentals=0,
        bytes_accessed=4 * (B * in_f + B * out_f
                            + in_f * hid + hid + hid * out_f + out_f),
    )

    yT = pl.pallas_call(
        toy_model_kernel,
        out_shape=jax.ShapeDtypeStruct((out_f, B), x.dtype),
        grid=grid,
        in_specs=[
            pl.BlockSpec((in_f, tb), lambda i: (0, i)),     # x^T batch tile (pipelined)
            pl.BlockSpec((hid, in_f), lambda i: (0, 0)),    # W1: VMEM-resident
            pl.BlockSpec((hid, 1), lambda i: (0, 0)),       # b1: VMEM-resident
            pl.BlockSpec((out_f, hid), lambda i: (0, 0)),   # W2: VMEM-resident
            pl.BlockSpec((out_f, 1), lambda i: (0, 0)),     # b2: VMEM-resident
        ],
        out_specs=pl.BlockSpec((out_f, tb), lambda i: (0, i)),
        compiler_params=pltpu.CompilerParams(
            dimension_semantics=("parallel",)),
        cost_estimate=cost,
    )(xT, w1, b1c, w2, b2c)

    return yT.T                                   # (B, 5)


def init_params(key):
    """Deterministic init matching nn.Linear default (uniform ±1/sqrt(fan_in))."""
    k1, k2, k3, k4 = jax.random.split(key, 4)
    bound = 1.0 / jnp.sqrt(10.0)
    w1 = jax.random.uniform(k1, (10, 10), jnp.float32, -bound, bound)  # [out, in]
    b1 = jax.random.uniform(k2, (10,), jnp.float32, -bound, bound)
    w2 = jax.random.uniform(k3, (5, 10), jnp.float32, -bound, bound)   # [out, in]
    b2 = jax.random.uniform(k4, (5,), jnp.float32, -bound, bound)
    return w1, b1, w2, b2


if __name__ == "__main__":
    key = jax.random.PRNGKey(0)
    k_x, k_p, k_x2 = jax.random.split(key, 3)

    w1, b1, w2, b2 = init_params(k_p)
    w1p, b1c, w2p, b2c = pack_params(w1, b1, w2, b2)

    def ref_fwd(x):
        return jnp.maximum(x @ w1.T + b1, 0.0) @ w2.T + b2

    # Small batch (matches the tutorial's toy usage): single full-extent block.
    x_small = jax.random.normal(k_x, (8, 10), jnp.float32)
    out_small = jax.block_until_ready(
        toy_model_forward(x_small, w1p, b1c, w2p, b2c))
    assert out_small.shape == (8, 5)
    assert jnp.allclose(out_small, ref_fwd(x_small), atol=1e-5, rtol=1e-5)

    # Larger batch: exercises the batch grid + resident-weight pipelining path.
    x_big = jax.random.normal(k_x2, (1024, 10), jnp.float32)
    out_big = jax.block_until_ready(
        toy_model_forward(x_big, w1p, b1c, w2p, b2c))
    assert out_big.shape == (1024, 5)
    assert jnp.allclose(out_big, ref_fwd(x_big), atol=1e-5, rtol=1e-5)

    print("KERNEL_OK")
</pallas_src>

<mosaic_0001>
module attributes {stable_mosaic.version = 11 : i64} {
  func.func @toy_model_kernel(%arg0: i32, %arg1: memref<10x8xf32, #tpu.memory_space<vmem>>, %arg2: memref<10x10xf32, #tpu.memory_space<vmem>>, %arg3: memref<10x1xf32, #tpu.memory_space<vmem>>, %arg4: memref<5x10xf32, #tpu.memory_space<vmem>>, %arg5: memref<5x1xf32, #tpu.memory_space<vmem>>, %arg6: memref<5x8xf32, #tpu.memory_space<vmem>>) attributes {dimension_semantics = [#tpu.dimension_semantics<parallel>], iteration_bounds = array<i64: 1>, scalar_prefetch = 0 : i64, scratch_operands = 0 : i64, tpu.core_type = #tpu.core_type<tc>, window_params = [{transform_indices = @transform_0, window_bounds = array<i64: 10, 8>}, {pipeline_mode = #tpu.pipeline_mode<synchronous>, transform_indices = @transform_1, window_bounds = array<i64: 10, 10>}, {pipeline_mode = #tpu.pipeline_mode<synchronous>, transform_indices = @transform_2, window_bounds = array<i64: 10, 1>}, {pipeline_mode = #tpu.pipeline_mode<synchronous>, transform_indices = @transform_3, window_bounds = array<i64: 5, 10>}, {pipeline_mode = #tpu.pipeline_mode<synchronous>, transform_indices = @transform_4, window_bounds = array<i64: 5, 1>}, {transform_indices = @transform_5, window_bounds = array<i64: 5, 8>}]} {
    %c0 = arith.constant 0 : index
    %c0_0 = arith.constant 0 : index
    %0 = vector.load %arg1[%c0, %c0_0] : memref<10x8xf32, #tpu.memory_space<vmem>>, vector<10x8xf32>
    %c0_1 = arith.constant 0 : index
    %c0_2 = arith.constant 0 : index
    %1 = vector.load %arg2[%c0_1, %c0_2] : memref<10x10xf32, #tpu.memory_space<vmem>>, vector<10x10xf32>
    %cst = arith.constant dense<0.000000e+00> : vector<10x8xf32>
    %2 = tpu.matmul %1, %0, %cst {dimension_numbers = #tpu.dot_dimension_numbers<[1], [0], [0], [1], [0, 0, 1, 1], [], []>} : vector<10x10xf32>, vector<10x8xf32>, vector<10x8xf32> -> vector<10x8xf32>
    %c0_3 = arith.constant 0 : index
    %c0_4 = arith.constant 0 : index
    %3 = vector.load %arg3[%c0_3, %c0_4] : memref<10x1xf32, #tpu.memory_space<vmem>>, vector<10x1xf32>
    %4 = vector.broadcast %3 : vector<10x1xf32> to vector<10x8xf32>
    %5 = arith.addf %2, %4 : vector<10x8xf32>
    %cst_5 = arith.constant 0.000000e+00 : f32
    %6 = vector.broadcast %cst_5 : f32 to vector<10x8xf32>
    %7 = arith.maximumf %5, %6 : vector<10x8xf32>
    %c0_6 = arith.constant 0 : index
    %c0_7 = arith.constant 0 : index
    %8 = vector.load %arg4[%c0_6, %c0_7] : memref<5x10xf32, #tpu.memory_space<vmem>>, vector<5x10xf32>
    %cst_8 = arith.constant dense<0.000000e+00> : vector<5x8xf32>
    %9 = tpu.matmul %8, %7, %cst_8 {dimension_numbers = #tpu.dot_dimension_numbers<[1], [0], [0], [1], [0, 0, 1, 1], [], []>} : vector<5x10xf32>, vector<10x8xf32>, vector<5x8xf32> -> vector<5x8xf32>
    %c0_9 = arith.constant 0 : index
    %c0_10 = arith.constant 0 : index
    %10 = vector.load %arg5[%c0_9, %c0_10] : memref<5x1xf32, #tpu.memory_space<vmem>>, vector<5x1xf32>
    %11 = vector.broadcast %10 : vector<5x1xf32> to vector<5x8xf32>
    %12 = arith.addf %9, %11 : vector<5x8xf32>
    %c0_11 = arith.constant 0 : index
    %c0_12 = arith.constant 0 : index
    %13 = vector.load %arg6[%c0_11, %c0_12] : memref<5x8xf32, #tpu.memory_space<vmem>>, vector<5x8xf32>
    tpu.vector_store %arg6[%c0_11, %c0_12], %12 {strides = array<i32>} : memref<5x8xf32, #tpu.memory_space<vmem>>, vector<5x8xf32>,
    return
  }
  func.func @transform_0(%arg0: i32) -> (i32, i32) {
    %c0_i32 = arith.constant 0 : i32
    %c0_i32_0 = arith.constant 0 : i32
    return %c0_i32, %arg0 : i32, i32
  }
  func.func @transform_1(%arg0: i32) -> (i32, i32) {
    %c0_i32 = arith.constant 0 : i32
    %c0_i32_0 = arith.constant 0 : i32
    %c0_i32_1 = arith.constant 0 : i32
    return %c0_i32, %c0_i32_0 : i32, i32
  }
  func.func @transform_2(%arg0: i32) -> (i32, i32) {
    %c0_i32 = arith.constant 0 : i32
    %c0_i32_0 = arith.constant 0 : i32
    %c0_i32_1 = arith.constant 0 : i32
    return %c0_i32, %c0_i32_0 : i32, i32
  }
  func.func @transform_3(%arg0: i32) -> (i32, i32) {
    %c0_i32 = arith.constant 0 : i32
    %c0_i32_0 = arith.constant 0 : i32
    %c0_i32_1 = arith.constant 0 : i32
    return %c0_i32, %c0_i32_0 : i32, i32
  }
  func.func @transform_4(%arg0: i32) -> (i32, i32) {
    %c0_i32 = arith.constant 0 : i32
    %c0_i32_0 = arith.constant 0 : i32
    %c0_i32_1 = arith.constant 0 : i32
    return %c0_i32, %c0_i32_0 : i32, i32
  }
  func.func @transform_5(%arg0: i32) -> (i32, i32) {
    %c0_i32 = arith.constant 0 : i32
    %c0_i32_0 = arith.constant 0 : i32
    return %c0_i32, %arg0 : i32, i32
  }
}

</mosaic_0001>

<bundles_post_ra>
// kernel: toy_model_forward.1
= control target key start
LH: loop header
LB: loop body
LE: loop exit
PB: predicated region body
PF: predicated region fallthrough
CT: control target
= control target key end

     0   :  { %vm43_vm0 = vcmask 1041408   ;;  %vm36_vm1 = vcmask 80896   ;;  %v244_v3 = vmov 0   ;;  %v245_v7 = vmov 0.0   ;;  %s310_s0 = inlined_call_operand.vmem [shape: f32[10,8], index: 0, kind: input, shape index: {}]   ;;  %s311_s1 = inlined_call_operand.vmem [shape: f32[10,10], index: 1, kind: input, shape index: {}]   ;;  %s312_s2 = inlined_call_operand.vmem [shape: f32[10,1], index: 2, kind: input, shape index: {}]   ;;  %s313_s4 = inlined_call_operand.vmem [shape: f32[5,1], index: 4, kind: input, shape index: {}]   ;;  %s314_s3 = inlined_call_operand.vmem [shape: f32[5,10], index: 3, kind: input, shape index: {}]   ;;  %s315_s5 = inlined_call_operand.vmem [shape: f32[5,8], index: 5, kind: output, shape index: {}]  }
   0x1   :  { %v21_v0 = vld [vmem:[%s310_s0 + $0x8] sm:$0x3]  ;;  %v20_v1 = vld [vmem:[%s310_s0] sm:$0xff]  ;;  %242 = vset.pattern.permute.xlu0 %v244_v3  ;;  %243 = vset.pattern.permute.xlu1 %v244_v3  ;;  %vm246_vm2 = vmmov 0   ;;  %vm207_vm3 = vcmask 61440  }
   0x2   :  { %v22_v2 = vld [vmem:[%s311_s1] sm:$0xff]  ;;  %225 = vmatprep.subr.msk.mxu0 %vm43_vm0, %v21_v0  ;;  %v25_v4 = vld [vmem:[%s312_s2 + $0x8] sm:$0x3]  ;;  %232 = vmatprep.subr.mxu1 %v245_v7 }
   0x3   :  { %229 = vmatprep.mubr.msk.f32.mxu0 %vm36_vm1, %v22_v2  ;;  %226 = vmatpush3.msk.msra.mxu0 %vm43_vm0, %v21_v0  ;;  %v23_v5 = vld [vmem:[%s311_s1 + $0x8] sm:$0x3]  ;;  %v24_v6 = vld [vmem:[%s312_s2] sm:$0xff] }
   0x4   :  { %33 = vperm.xlu0 %242, %v25_v4   ;;  %227 = vmatprep.subr.mxu0 %v20_v1  ;;  %v125_v8 = vld [vmem:[%s313_s4] sm:$0x1f] }
   0x5   :  { %228 = vmatpush3.msra.mxu0 %v20_v1  ;;  %236 = vmatprep.mubr.msk.f32.mxu1 %vm246_vm2, %v245_v7  ;;  %v124_v17 = vld [vmem:[%s314_s3] sm:$0x1f] }
   0x6   :  { %230 = vmatmul.mubr.msk.f32.vlgmr.msra.gmra.mxu0 %vm36_vm1, %v23_v5  ;;  %128 = vperm.xlu1 %243, %v125_v8  }
   0x8   :  { %28 = vperm.xlu0 %242, %v24_v6  }
  0x7f   :  { %v34_v9 = vpop.permute.xlu0 %33 }
  0x81   :  { %v129_v18 = vpop.permute.xlu1 %128 }
  0x83   :  { %v29_v12 = vpop.permute.xlu0 %28 }
  0xc6   :  { %v231_v10 = vpop.f32.mrf.mxu0 }
  0xc7   :  { %v119_v11 = vadd.f32 %v231_v10, %v34_v9 }
  0xc8   :  { %v113_v13 = vpop.f32.mrf.mxu0 }
  0xc9   :  { %v123_v14 = vmax.f32 %v119_v11, 0.0  ;;  %v114_v15 = vadd.f32 %v113_v13, %v29_v12 }
  0xcb   :  { %v122_v16 = vmax.f32 %v114_v15, 0.0  ;;  %233 = vmatpush3.msk.msra.mxu1 %vm43_vm0, %v123_v14 }
  0xcc   :  { %234 = vmatprep.subr.mxu1 %v245_v7 }
  0xcd   :  { %235 = vmatpush3.msra.mxu1 %v122_v16 }
  0xce   :  { %237 = vmatmul.mubr.msk.f32.vlgmr.msra.gmra.mxu1 %vm36_vm1, %v124_v17 }
 0x18e   :  { %v203_v19 = vpop.f32.mrf.mxu1 }
 0x18f   :  { %v204_v20 = vadd.f32 %v203_v19, %v129_v18 }
 0x190   :  { %v238_v21 = vpop.f32.mrf.mxu1 }
 0x191   :  { %208 = vst.msk [vmem:[%s315_s5] sm:$0x1f] %vm207_vm3, %v204_v20 }

</bundles_post_ra>
